<compile_context>
chip_gen: v6e
topology: v6e:2x2x1
jax: 0.10.0
libtpu: 0.0.40
codegen_flags: <defaults>
</compile_context>

<pallas_src>
import functools

import jax
import jax.numpy as jnp
from jax.experimental import pallas as pl
from jax.experimental.pallas import tpu as pltpu

MODELS = {
    'efficientnet-b0': [('reduction_1', (0, 2)), ('reduction_2', (2, 4)),
                        ('reduction_3', (4, 6)), ('reduction_4', (6, 12))],
    'efficientnet-b4': [('reduction_1', (0, 3)), ('reduction_2', (3, 7)),
                        ('reduction_3', (7, 11)), ('reduction_4', (11, 23))],
}

# efficientnet-b0 MBConv block args: (expand_ratio, kernel, stride, in_ch, out_ch, se_ratio)
B0_BLOCK_ARGS = [
    (1, 3, 1, 32, 16, 0.25),
    (6, 3, 2, 16, 24, 0.25), (6, 3, 1, 24, 24, 0.25),
    (6, 5, 2, 24, 40, 0.25), (6, 5, 1, 40, 40, 0.25),
    (6, 3, 2, 40, 80, 0.25), (6, 3, 1, 80, 80, 0.25), (6, 3, 1, 80, 80, 0.25),
    (6, 5, 1, 80, 112, 0.25), (6, 5, 1, 112, 112, 0.25), (6, 5, 1, 112, 112, 0.25),
    (6, 5, 2, 112, 192, 0.25), (6, 5, 1, 192, 192, 0.25), (6, 5, 1, 192, 192, 0.25),
    (6, 5, 1, 192, 192, 0.25),
    (6, 3, 1, 192, 320, 0.25),
]

BN_EPS = 1e-3
LANE = 128
STEM_K = 32          # stem im2col width (3*3*3=27 padded only to 32, not 128)


def _rup(n, m):
    return ((n + m - 1) // m) * m


def _cp(c):
    """Padded (lane-dense) channel count."""
    return _rup(max(int(c), 1), LANE)


def _vmem_limit_bytes():
    """Generation-aware scoped-VMEM limit: ~half of physical VMEM, capped at 64 MiB.
    v5e/v6e (128 MiB) -> 64 MiB; v7x (64 MiB/TC) -> 32 MiB."""
    cap = 64 * 1024 * 1024            # conservative fallback if the query fails
    try:
        cap = int(pltpu.get_tpu_info().vmem_capacity_bytes)
    except Exception:
        pass
    return max(32 * 1024 * 1024, min(cap // 2, 64 * 1024 * 1024))


VMEM_LIMIT = _vmem_limit_bytes()


# ----------------------------------------------------------------------------
# Pallas kernels
# ----------------------------------------------------------------------------
def _conv1x1_kernel(*refs, act, has_se, has_res):
    """y = act(((x [* se_gate]) @ w) * scale + bias) [+ residual].

    x:[1,tm,K] bf16, w:[K,Cout] bf16, scale/bias:[1,Cout] f32.
    If has_se: pool:[1,nb,1,K] f32 (per-band partial means of the depthwise output),
    se_w1:[K,Cse], se_b1:[1,Cse], se_w2:[Cse,K], se_b2:[1,K] (all f32).  The SE gate
    is recomputed per row tile (a few 1e5 MACs) instead of a separate pallas_call.
    If has_res: residual:[1,tm,Cout] bf16.  Output:[1,tm,Cout] bf16.
    """
    x_ref, w_ref, scale_ref, bias_ref = refs[:4]
    o_ref = refs[-1]
    idx = 4
    if has_se:
        pool_ref, w1_ref, b1_ref, w2_ref, b2_ref = refs[idx:idx + 5]
        idx += 5
        # Global-average pool = sum of the per-band partial means (already 1/(Ho*Wo)-scaled).
        p = jnp.sum(pool_ref[0, :, 0, :], axis=0, keepdims=True)          # [1, K] f32
        h = jnp.dot(p, w1_ref[...], preferred_element_type=jnp.float32) + b1_ref[...]
        h = h * jax.nn.sigmoid(h)                                         # swish
        g = jnp.dot(h, w2_ref[...], preferred_element_type=jnp.float32) + b2_ref[...]
        # NOTE: padded lanes evaluate sigmoid(0)=0.5, but the matching x lanes and
        # project_w rows are zero, so the channel padding stays exactly zero downstream.
        gate = jax.nn.sigmoid(g).astype(jnp.bfloat16)                     # [1, K]
        xg = x_ref[0] * gate                                              # bf16 multiply
    else:
        xg = x_ref[0]
    y = jnp.dot(xg, w_ref[...], preferred_element_type=jnp.float32)
    y = y * scale_ref[...] + bias_ref[...]
    if act == 'swish':
        y = y * jax.nn.sigmoid(y)
    if has_res:
        y = y + refs[idx][0].astype(jnp.float32)
    o_ref[0] = y.astype(o_ref.dtype)


def _dw_bn_swish_kernel(x_hbm, w_ref, scale_ref, bias_ref, o_ref, pool_ref,
                        xbuf, sem, *, k, s, tb, tb_in, Wo, C, inv_hw):
    """One band of `tb` output rows: depthwise kxk conv + BN + swish, plus the band's
    contribution to the SE global-average pool (pre-scaled by 1/(Ho*Wo)).

    x_hbm: raw HBM ref [N,Hp,Wp,C] (s==1) or [N,Hp/2,Wp/2,4C] (s==2, phase-packed).
    The needed (tb + halo) input rows are DMA'd into a VMEM scratch, so per-step VMEM
    stays bounded at any resolution and the (N, bands) grid is fully parallel.
    """
    n = pl.program_id(0)
    b = pl.program_id(1)
    row0 = b * tb
    cp = pltpu.make_async_copy(x_hbm.at[pl.ds(n, 1), pl.ds(row0, tb_in)], xbuf, sem)
    cp.start()
    cp.wait()
    # TODO(synk): double-buffer this band DMA across grid steps to overlap with compute.

    w = w_ref[...]                                           # hoisted (k*k, C) f32 load
    acc = jnp.zeros((tb, Wo, C), jnp.float32)
    for i in range(k):
        for j in range(k):
            if s == 1:
                tap = xbuf[0, pl.ds(i, tb), pl.ds(j, Wo), :]
            else:       # stride 2: space-to-depth phases packed on the lane axis
                ph = (i % 2) * 2 + (j % 2)
                tap = xbuf[0, pl.ds(i // 2, tb), pl.ds(j // 2, Wo), pl.ds(ph * C, C)]
            acc = acc + tap.astype(jnp.float32) * w[i * k + j]
    y = acc * scale_ref[...] + bias_ref[...]
    y = y * jax.nn.sigmoid(y)                                # swish (f32)
    o_ref[0] = y.astype(o_ref.dtype)
    pool_ref[...] = (jnp.sum(y, axis=(0, 1)) * inv_hw).reshape(1, 1, 1, C)


# ----------------------------------------------------------------------------
# Pallas wrappers
# ----------------------------------------------------------------------------
def _pick_row_tile(S, max_tile=512):
    """Row tile for the 1x1 matmuls: any multiple of 8 (minimal padding)."""
    Sp = _rup(S, 8)
    if Sp <= max_tile:
        return Sp, Sp
    for t in range(max_tile, 127, -8):
        if Sp % t == 0:
            return t, Sp
    return 256, _rup(S, 256)        # no nice divisor >= 128: pad rows to x256


def conv1x1_bn_act(x, w, scale, bias, act='swish', se=None, residual=None):
    """x:[N,S,K] bf16; w:[K,Cout] bf16; scale/bias:[1,Cout] f32;
    se = (pooled [N,nb,1,K] f32, w1, b1, w2, b2) or None; residual:[N,S,Cout] bf16 or None.
    Returns [N,S,Cout] bf16."""
    N, S, K = x.shape
    Cout = w.shape[1]
    tm, Sp = _pick_row_tile(S)
    if Sp != S:
        x = jnp.pad(x, ((0, 0), (0, Sp - S), (0, 0)))
        if residual is not None:
            residual = jnp.pad(residual, ((0, 0), (0, Sp - S), (0, 0)))

    in_specs = [
        pl.BlockSpec((1, tm, K), lambda n, t: (n, t, 0)),
        pl.BlockSpec((K, Cout), lambda n, t: (0, 0)),
        pl.BlockSpec((1, Cout), lambda n, t: (0, 0)),
        pl.BlockSpec((1, Cout), lambda n, t: (0, 0)),
    ]
    args = [x, w, scale, bias]
    if se is not None:
        pooled, w1, b1, w2, b2 = se
        nb = pooled.shape[1]
        Cse = w1.shape[1]
        in_specs += [
            pl.BlockSpec((1, nb, 1, K), lambda n, t: (n, 0, 0, 0)),
            pl.BlockSpec((K, Cse), lambda n, t: (0, 0)),
            pl.BlockSpec((1, Cse), lambda n, t: (0, 0)),
            pl.BlockSpec((Cse, K), lambda n, t: (0, 0)),
            pl.BlockSpec((1, K), lambda n, t: (0, 0)),
        ]
        args += [pooled, w1, b1, w2, b2]
    if residual is not None:
        in_specs.append(pl.BlockSpec((1, tm, Cout), lambda n, t: (n, t, 0)))
        args.append(residual)

    kernel = functools.partial(_conv1x1_kernel, act=act,
                               has_se=se is not None,
                               has_res=residual is not None)
    out = pl.pallas_call(
        kernel,
        grid=(N, Sp // tm),
        in_specs=in_specs,
        out_specs=pl.BlockSpec((1, tm, Cout), lambda n, t: (n, t, 0)),
        out_shape=jax.ShapeDtypeStruct((N, Sp, Cout), jnp.bfloat16),
        compiler_params=pltpu.CompilerParams(
            dimension_semantics=("parallel", "parallel"),
            vmem_limit_bytes=VMEM_LIMIT),
    )(*args)
    if Sp != S:
        out = out[:, :S, :]
    return out


def _same_pad(size, k, s):
    out = -(-size // s)
    pad = max((out - 1) * s + k - size, 0)
    return (pad // 2, pad - pad // 2), out


def _prep_depthwise_input(x, k, s):
    """TF-'SAME' spatial pad; for stride 2 also space-to-depth so in-kernel taps are
    stride-1.  x:[N,H,W,C] -> ([N,Hp,Wp,C] or [N,Hp/2,Wp/2,4C], Ho, Wo)."""
    N, H, W, C = x.shape
    (pt, pb), Ho = _same_pad(H, k, s)
    (pL, pR), Wo = _same_pad(W, k, s)
    if s == 2:
        pb += (H + pt + pb) % 2
        pR += (W + pL + pR) % 2
    xp = jnp.pad(x, ((0, 0), (pt, pb), (pL, pR), (0, 0)))
    if s == 2:
        _, Hp, Wp, _ = xp.shape
        xp = xp.reshape(N, Hp // 2, 2, Wp // 2, 2, C)
        xp = xp.transpose(0, 1, 3, 2, 4, 5).reshape(N, Hp // 2, Wp // 2, 4 * C)
    return xp, Ho, Wo


def _pick_band(Ho, max_band=32):
    """Largest divisor of Ho <= max_band (whole image if Ho is small or awkward)."""
    if Ho <= max_band:
        return Ho
    for t in range(max_band, 1, -1):
        if Ho % t == 0:
            return t
    return Ho


def depthwise_bn_swish(x, w, scale, bias, k, s):
    """x:[N,H,W,C] bf16 (C lane-padded); w:[k*k,C] f32.
    Returns (y [N,Ho,Wo,C] bf16, per-band partial pool means [N,nb,1,C] f32)."""
    N, H, W, C = x.shape
    xp, Ho, Wo = _prep_depthwise_input(x, k, s)
    _, Hpr, Wp, Cx = xp.shape
    tb = _pick_band(Ho)
    nb = Ho // tb
    halo = (k - 1) if s == 1 else (k - 1) // 2
    tb_in = tb + halo
    kernel = functools.partial(_dw_bn_swish_kernel, k=k, s=s, tb=tb, tb_in=tb_in,
                               Wo=Wo, C=C, inv_hw=1.0 / float(Ho * Wo))
    y, pooled = pl.pallas_call(
        kernel,
        grid=(N, nb),
        in_specs=[
            pl.BlockSpec(memory_space=pl.ANY),          # raw HBM; banded DMA in-kernel
            pl.BlockSpec((k * k, C), lambda n, b: (0, 0)),
            pl.BlockSpec((1, C), lambda n, b: (0, 0)),
            pl.BlockSpec((1, C), lambda n, b: (0, 0)),
        ],
        out_specs=[
            pl.BlockSpec((1, tb, Wo, C), lambda n, b: (n, b, 0, 0)),
            pl.BlockSpec((1, 1, 1, C), lambda n, b: (n, b, 0, 0)),
        ],
        out_shape=(
            jax.ShapeDtypeStruct((N, Ho, Wo, C), jnp.bfloat16),
            jax.ShapeDtypeStruct((N, nb, 1, C), jnp.float32),
        ),
        scratch_shapes=[
            pltpu.VMEM((1, tb_in, Wp, Cx), xp.dtype),
            pltpu.SemaphoreType.DMA(()),
        ],
        compiler_params=pltpu.CompilerParams(
            dimension_semantics=("parallel", "parallel"),
            vmem_limit_bytes=VMEM_LIMIT),
    )(xp, w, scale, bias)
    return y, pooled


# ----------------------------------------------------------------------------
# JAX glue: stem im2col (3 input channels only -> tiny)
# ----------------------------------------------------------------------------
def _extract_patches(x, k, s):
    """x:[N,H,W,C] -> [N,Ho,Wo,k,k,C] with TF-'SAME' padding (stem only, C=3)."""
    N, H, W, C = x.shape
    (pt, pb), Ho = _same_pad(H, k, s)
    (pL, pR), Wo = _same_pad(W, k, s)
    xp = jnp.pad(x, ((0, 0), (pt, pb), (pL, pR), (0, 0)))
    rows = []
    for i in range(k):
        cols = []
        for j in range(k):
            cols.append(xp[:, i:i + s * (Ho - 1) + 1:s, j:j + s * (Wo - 1) + 1:s, :])
        rows.append(jnp.stack(cols, axis=3))
    return jnp.stack(rows, axis=3)          # [N,Ho,Wo,k,k,C]


# ----------------------------------------------------------------------------
# Parameter init (deterministic, synthetic, lane-padded, bf16 matmul weights)
# ----------------------------------------------------------------------------
def _init_conv(key, fan_in, shape):
    return jax.random.normal(key, shape, jnp.float32) / jnp.sqrt(float(fan_in))


def _pad2(w, r, c):
    return jnp.pad(w, ((0, r - w.shape[0]), (0, c - w.shape[1])))


def _bn_fold(key, c, cp):
    kg, kb = jax.random.split(key)
    gamma = 1.0 + 0.1 * jax.random.normal(kg, (c,), jnp.float32)
    beta = 0.1 * jax.random.normal(kb, (c,), jnp.float32)
    scale = gamma / jnp.sqrt(1.0 + BN_EPS)          # running_var=1, running_mean=0
    bias = beta
    scale = jnp.pad(scale, (0, cp - c)).reshape(1, cp)
    bias = jnp.pad(bias, (0, cp - c)).reshape(1, cp)
    return scale, bias


def _init_block(key, args):
    e, k, s, cin, cout, se_ratio = args
    cmid = cin * e
    cse = max(1, int(cin * se_ratio))
    cin_p, cmid_p, cout_p, cse_p = _cp(cin), _cp(cmid), _cp(cout), _cp(cse)
    keys = iter(jax.random.split(key, 16))
    p = dict(expand_ratio=e, kernel=k, stride=s, id_skip=True, cin=cin, cout=cout)
    if e != 1:
        w = _init_conv(next(keys), cin, (cin, cmid))
        p['expand_w'] = _pad2(w, cin_p, cmid_p).astype(jnp.bfloat16)
        p['bn0_scale'], p['bn0_bias'] = _bn_fold(next(keys), cmid, cmid_p)
    dw = _init_conv(next(keys), k * k, (k * k, cmid))
    p['dw_w'] = jnp.pad(dw, ((0, 0), (0, cmid_p - cmid)))                 # f32 (VPU)
    p['bn1_scale'], p['bn1_bias'] = _bn_fold(next(keys), cmid, cmid_p)
    w1 = _init_conv(next(keys), cmid, (cmid, cse))
    p['se_w1'] = _pad2(w1, cmid_p, cse_p)                                 # f32 (tiny)
    b1 = 0.1 * jax.random.normal(next(keys), (cse,), jnp.float32)
    p['se_b1'] = jnp.pad(b1, (0, cse_p - cse)).reshape(1, cse_p)
    w2 = _init_conv(next(keys), cse, (cse, cmid))
    p['se_w2'] = _pad2(w2, cse_p, cmid_p)
    b2 = 0.1 * jax.random.normal(next(keys), (cmid,), jnp.float32)
    p['se_b2'] = jnp.pad(b2, (0, cmid_p - cmid)).reshape(1, cmid_p)
    wp = _init_conv(next(keys), cmid, (cmid, cout))
    p['project_w'] = _pad2(wp, cmid_p, cout_p).astype(jnp.bfloat16)
    p['bn2_scale'], p['bn2_bias'] = _bn_fold(next(keys), cout, cout_p)
    return p


# ----------------------------------------------------------------------------
# Forward passes
# ----------------------------------------------------------------------------
def stem_forward(x, p):
    """conv_stem (3x3, stride 2, SAME) + BN + swish.  x: NHWC f32 (3 channels)."""
    N, H, W, C = x.shape
    patches = _extract_patches(x, 3, 2)                       # [N,Ho,Wo,3,3,3] (tiny)
    Ho, Wo = patches.shape[1], patches.shape[2]
    pr = patches.reshape(N, Ho * Wo, 9 * C)
    pr = jnp.pad(pr, ((0, 0), (0, 0), (0, STEM_K - 9 * C))).astype(jnp.bfloat16)
    y = conv1x1_bn_act(pr, p['stem_w'], p['bn_scale'], p['bn_bias'], act='swish')
    return y.reshape(N, Ho, Wo, p['stem_w'].shape[1])


def mbconv_forward(x, p):
    """MBConv: expand -> depthwise(+band pools) -> project with fused SE gate (+skip)."""
    N, H, W, Cin_p = x.shape
    inputs = x
    k, s = p['kernel'], p['stride']
    if p['expand_ratio'] != 1:
        cmid_p = p['expand_w'].shape[1]
        h = conv1x1_bn_act(x.reshape(N, H * W, Cin_p), p['expand_w'],
                           p['bn0_scale'], p['bn0_bias'], act='swish')
        x = h.reshape(N, H, W, cmid_p)
    Cmid_p = x.shape[-1]
    y, pooled = depthwise_bn_swish(x, p['dw_w'], p['bn1_scale'], p['bn1_bias'], k, s)
    _, Ho, Wo, _ = y.shape
    Cout_p = p['project_w'].shape[1]
    residual = None
    if p['id_skip'] and s == 1 and p['cin'] == p['cout']:
        # drop_connect is identity in eval mode, so the skip is a plain add.
        residual = inputs.reshape(N, Ho * Wo, Cout_p)
    out = conv1x1_bn_act(y.reshape(N, Ho * Wo, Cmid_p), p['project_w'],
                         p['bn2_scale'], p['bn2_bias'], act='none',
                         se=(pooled, p['se_w1'], p['se_b1'], p['se_w2'], p['se_b2']),
                         residual=residual)
    return out.reshape(N, Ho, Wo, Cout_p)


# ----------------------------------------------------------------------------
# EfficientNetExtractor equivalent
# ----------------------------------------------------------------------------
class EfficientNetExtractorPallas:
    def __init__(self, layer_names, image_height, image_width,
                 model_name='efficientnet-b0', key=None):
        assert model_name in MODELS
        # TODO(synk): efficientnet-b4 block configuration not included; b0 only.
        assert model_name == 'efficientnet-b0'
        valid = [k for k, _ in MODELS[model_name]]
        assert all(k in valid for k in layer_names)

        idx_max = -1
        layer_to_idx = {}
        for i, (layer_name, _) in enumerate(MODELS[model_name]):
            if layer_name in layer_names:
                idx_max = max(idx_max, i)
                layer_to_idx[layer_name] = i

        key = jax.random.PRNGKey(0) if key is None else key
        keys = iter(jax.random.split(key, 128))

        # stem (= layers[0] in the torch module); im2col width kept at 32 (not 128)
        stem_w = _init_conv(next(keys), 27, (27, 32))
        self.stem = dict(
            stem_w=_pad2(stem_w, STEM_K, _cp(32)).astype(jnp.bfloat16))
        self.stem['bn_scale'], self.stem['bn_bias'] = _bn_fold(next(keys), 32, _cp(32))

        # block groups (= layers[1:]), mirroring the torch grouping logic
        self.groups = []
        self.group_channels = []
        for idx in range(idx_max):
            l, r = MODELS[model_name][idx][1]
            self.groups.append(
                [_init_block(next(keys), B0_BLOCK_ARGS[i]) for i in range(l, r)])
            self.group_channels.append(B0_BLOCK_ARGS[r - 1][4])

        self.layer_names = layer_names
        self.idx_pick = [layer_to_idx[l] for l in layer_names]

        # torch module runs a dummy (1, 3, H, W) through itself to record output shapes
        dummy = jnp.zeros((1, 3, image_height, image_width), jnp.float32)
        self.output_shapes = [tuple(int(d) for d in o.shape) for o in self(dummy)]

    def __call__(self, x):
        # x is NCHW (PyTorch); internally NHWC, bf16 activations, lane-padded channels.
        x = jnp.transpose(x, (0, 2, 3, 1)).astype(jnp.float32)
        feats = []
        h = stem_forward(x, self.stem)
        feats.append((h, 32))
        for group, chans in zip(self.groups, self.group_channels):
            for bp in group:
                h = mbconv_forward(h, bp)
            feats.append((h, chans))
        outs = []
        for i in self.idx_pick:
            f, c = feats[i]
            outs.append(jnp.transpose(f[..., :c], (0, 3, 1, 2)).astype(jnp.float32))
        return outs


if __name__ == "__main__":
    key = jax.random.PRNGKey(0)
    kx, kp = jax.random.split(key)

    backbone = EfficientNetExtractorPallas(
        ['reduction_1', 'reduction_2', 'reduction_3'],
        image_height=16, image_width=16,
        model_name='efficientnet-b0', key=kp)

    x = jax.random.normal(kx, (2, 3, 16, 16), jnp.float32)   # NCHW, like PyTorch
    outs = backbone(x)
    outs = [jax.block_until_ready(o) for o in outs]

    expected = [(2, 32, 8, 8), (2, 24, 4, 4), (2, 40, 2, 2)]
    assert [tuple(o.shape) for o in outs] == expected, [o.shape for o in outs]
    assert all(bool(jnp.all(jnp.isfinite(o))) for o in outs)

    print("KERNEL_OK")
</pallas_src>

<mosaic_0001>
module attributes {stable_mosaic.version = 11 : i64} {
  func.func @_conv1x1_kernel(%arg0: i32, %arg1: i32, %arg2: memref<1x64x32xbf16, #tpu.memory_space<vmem>>, %arg3: memref<32x128xbf16, #tpu.memory_space<vmem>>, %arg4: memref<1x128xf32, #tpu.memory_space<vmem>>, %arg5: memref<1x128xf32, #tpu.memory_space<vmem>>, %arg6: memref<1x64x128xbf16, #tpu.memory_space<vmem>>) attributes {dimension_semantics = [#tpu.dimension_semantics<parallel>, #tpu.dimension_semantics<parallel>], iteration_bounds = array<i64: 1, 1>, scalar_prefetch = 0 : i64, scratch_operands = 0 : i64, tpu.core_type = #tpu.core_type<tc>, window_params = [{transform_indices = @transform_0, window_bounds = array<i64: 1, 64, 32>}, {pipeline_mode = #tpu.pipeline_mode<synchronous>, transform_indices = @transform_1, window_bounds = array<i64: 32, 128>}, {pipeline_mode = #tpu.pipeline_mode<synchronous>, transform_indices = @transform_2, window_bounds = array<i64: 1, 128>}, {pipeline_mode = #tpu.pipeline_mode<synchronous>, transform_indices = @transform_3, window_bounds = array<i64: 1, 128>}, {transform_indices = @transform_4, window_bounds = array<i64: 1, 64, 128>}]} {
    %c0 = arith.constant 0 : index
    %c0_0 = arith.constant 0 : index
    %c0_1 = arith.constant 0 : index
    %0 = vector.load %arg2[%c0, %c0_0, %c0_1] : memref<1x64x32xbf16, #tpu.memory_space<vmem>>, vector<1x64x32xbf16>
    %1 = vector.shape_cast %0 : vector<1x64x32xbf16> to vector<64x32xbf16>
    %c0_2 = arith.constant 0 : index
    %c0_3 = arith.constant 0 : index
    %2 = vector.load %arg3[%c0_2, %c0_3] : memref<32x128xbf16, #tpu.memory_space<vmem>>, vector<32x128xbf16>
    %cst = arith.constant dense<0.000000e+00> : vector<64x128xf32>
    %3 = tpu.matmul %1, %2, %cst {dimension_numbers = #tpu.dot_dimension_numbers<[1], [0], [0], [1], [0, 0, 1, 1], [], []>} : vector<64x32xbf16>, vector<32x128xbf16>, vector<64x128xf32> -> vector<64x128xf32>
    %c0_4 = arith.constant 0 : index
    %c0_5 = arith.constant 0 : index
    %4 = vector.load %arg4[%c0_4, %c0_5] : memref<1x128xf32, #tpu.memory_space<vmem>>, vector<1x128xf32>
    %5 = vector.broadcast %4 : vector<1x128xf32> to vector<64x128xf32>
    %6 = arith.mulf %3, %5 : vector<64x128xf32>
    %c0_6 = arith.constant 0 : index
    %c0_7 = arith.constant 0 : index
    %7 = vector.load %arg5[%c0_6, %c0_7] : memref<1x128xf32, #tpu.memory_space<vmem>>, vector<1x128xf32>
    %8 = vector.broadcast %7 : vector<1x128xf32> to vector<64x128xf32>
    %9 = arith.addf %6, %8 : vector<64x128xf32>
    %10 = arith.negf %9 : vector<64x128xf32>
    %11 = math.exp %10 : vector<64x128xf32>
    %cst_8 = arith.constant 1.000000e+00 : f32
    %12 = vector.broadcast %cst_8 : f32 to vector<64x128xf32>
    %13 = arith.addf %12, %11 : vector<64x128xf32>
    %14 = arith.divf %12, %13 : vector<64x128xf32>
    %15 = arith.mulf %9, %14 : vector<64x128xf32>
    %16 = arith.truncf %15 : vector<64x128xf32> to vector<64x128xbf16>
    %c0_9 = arith.constant 0 : index
    %c0_10 = arith.constant 0 : index
    %c0_11 = arith.constant 0 : index
    %17 = vector.load %arg6[%c0_9, %c0_10, %c0_11] : memref<1x64x128xbf16, #tpu.memory_space<vmem>>, vector<1x64x128xbf16>
    %18 = vector.shape_cast %17 : vector<1x64x128xbf16> to vector<64x128xbf16>
    %19 = vector.shape_cast %16 : vector<64x128xbf16> to vector<1x64x128xbf16>
    tpu.vector_store %arg6[%c0_9, %c0_10, %c0_11], %19 {strides = array<i32>} : memref<1x64x128xbf16, #tpu.memory_space<vmem>>, vector<1x64x128xbf16>,
    return
  }
  func.func @transform_0(%arg0: i32, %arg1: i32) -> (i32, i32, i32) {
    %c0_i32 = arith.constant 0 : i32
    %c0_i32_0 = arith.constant 0 : i32
    return %arg0, %arg1, %c0_i32 : i32, i32, i32
  }
  func.func @transform_1(%arg0: i32, %arg1: i32) -> (i32, i32) {
    %c0_i32 = arith.constant 0 : i32
    %c0_i32_0 = arith.constant 0 : i32
    %c0_i32_1 = arith.constant 0 : i32
    return %c0_i32, %c0_i32_0 : i32, i32
  }
  func.func @transform_2(%arg0: i32, %arg1: i32) -> (i32, i32) {
    %c0_i32 = arith.constant 0 : i32
    %c0_i32_0 = arith.constant 0 : i32
    %c0_i32_1 = arith.constant 0 : i32
    return %c0_i32, %c0_i32_0 : i32, i32
  }
  func.func @transform_3(%arg0: i32, %arg1: i32) -> (i32, i32) {
    %c0_i32 = arith.constant 0 : i32
    %c0_i32_0 = arith.constant 0 : i32
    %c0_i32_1 = arith.constant 0 : i32
    return %c0_i32, %c0_i32_0 : i32, i32
  }
  func.func @transform_4(%arg0: i32, %arg1: i32) -> (i32, i32, i32) {
    %c0_i32 = arith.constant 0 : i32
    %c0_i32_0 = arith.constant 0 : i32
    return %arg0, %arg1, %c0_i32 : i32, i32, i32
  }
}

</mosaic_0001>

<bundles_post_ra>
// kernel: tpu_custom_call.1
= control target key start
LH: loop header
LB: loop body
LE: loop exit
PB: predicated region body
PF: predicated region fallthrough
CT: control target
= control target key end

     0   :  { %vm63_vm0 = vcmask 261120   ;;  %s498_s0 = inlined_call_operand.vmem [shape: bf16[1,64,32], index: 0, kind: input, shape index: {}]   ;;  %s499_s1 = inlined_call_operand.vmem [shape: bf16[32,128], index: 1, kind: input, shape index: {}]   ;;  %s500_s2 = inlined_call_operand.vmem [shape: f32[1,128], index: 2, kind: input, shape index: {}]   ;;  %s501_s3 = inlined_call_operand.vmem [shape: f32[1,128], index: 3, kind: input, shape index: {}]   ;;  %s502_s4 = inlined_call_operand.hbm [shape: bf16[1,64,128], index: 4, kind: output, shape index: {}]  }
   0x1   :  { %v367_v0 = vld [vmem:[%s499_s1 + $0x8] sm:$0xff]   ;;  %v368_v1 = vld [vmem:[%s499_s1] sm:$0xff]   ;;  %v370_v3 = vld [vmem:[%s498_s0 + $0x10] sm:$0xff]  }
   0x2   :  { %348 = vmatprep.subr.bf16.mxu0 %v367_v0  ;;  %360 = vmatprep.subr.bf16.mxu1 %v367_v0  ;;  %v369_v2 = vld [vmem:[%s498_s0] sm:$0xff]   ;;  %v371_v4 = vld [vmem:[%s498_s0 + $0x8] sm:$0xff]   ;;  %v372_v5 = vld [vmem:[%s498_s0 + $0x18] sm:$0xff]  }
   0x3   :  { %349 = vmatpush3.bf16.msra.mxu0 %v367_v0  ;;  %362 = vmatpush3.bf16.msra.mxu1 %v367_v0 }
   0x4   :  { %350 = vmatprep.subr.bf16.mxu0 %v368_v1  ;;  %361 = vmatprep.subr.bf16.mxu1 %v368_v1 }
   0x5   :  { %352 = vmatprep.mubr.msk.bf16.mxu0 %vm63_vm0, %v369_v2  ;;  %356 = vmatprep.mubr.msk.bf16.mxu1 %vm63_vm0, %v370_v3 }
   0x6   :  { %9 = vsyncpa [#allocation3], 0  ;;  %v293_v6 = vld [vmem:[%s500_s2] ss:$0 sm:$0xff]  ;;  %s427_s0 = smov [#allocation2]  }
   0x7   :  { %351 = vmatpush3.bf16.msra.mxu0 %v368_v1  ;;  %363 = vmatpush3.bf16.msra.mxu1 %v368_v1  ;;  %v294_v8 = vld [vmem:[%s501_s3] ss:$0 sm:$0xff]  ;;  %s272_s2 = sshll.u32 %s427_s0, 4  ;;  %s273_s2 = int_to_ptr.vmem [resolvable:$true] %s272_s2 }
   0x8   :  { %s405_s3 = scalar_lea.vmem %s273_s2, 512  ;;  %p410_p1 = scmp.lt.s32.totalorder %s273_s2, %s273_s2 }
   0x9   :  { %p406_p0 = scmp.ne.s32.totalorder %s273_s2, %s405_s3  ;;  %p411_p2 = scmp.lt.s32.totalorder %s405_s3, %s405_s3 }
   0xa   :  { %353 = vmatmul.mubr.msk.bf16.vlgmr.msra.gmra.mxu0 %vm63_vm0, %v371_v4  ;;  %357 = vmatmul.mubr.msk.bf16.vlgmr.msra.gmra.mxu1 %vm63_vm0, %v372_v5 }
   0xb   :  { %p412_p3 = por %p411_p2, %p410_p1 }
   0xd   :  { %p413_p4 = pnand %p412_p3, %p406_p0 }
  0xca   :  { %v354_v7 = vpop.f32.mrf.mxu0  ;;  %v358_v9 = vpop.f32.mrf.mxu1 }
  0xcb   :  { %v150_v10 = vmul.f32 %v354_v7, %v293_v6  ;;  %v154_v11 = vmul.f32 %v358_v9, %v293_v6 }
  0xcc   :  { %v110_v12 = vpop.f32.mrf.mxu0  ;;  %v126_v13 = vpop.f32.mrf.mxu1 }
  0xcd   :  { %v479_v14 = vadd.f32 %v294_v8, %v150_v10  ;;  %v481_v15 = vadd.f32 %v294_v8, %v154_v11  ;;  %v148_v16 = vmul.f32 %v293_v6, %v110_v12  ;;  %v152_v17 = vmul.f32 %v293_v6, %v126_v13 }
  0xce   :  { %v355_v18 = vpop.f32.mrf.mxu0  ;;  %v359_v19 = vpop.f32.mrf.mxu1 }
  0xcf   :  { %v297_v20 = vmul.f32 -1.442695, %v479_v14  ;;  %v301_v21 = vmul.f32 -1.442695, %v481_v15  ;;  %v485_v22 = vadd.f32 %v294_v8, %v148_v16  ;;  %v487_v23 = vadd.f32 %v294_v8, %v152_v17 }
  0xd0   :  { %v151_v24 = vmul.f32 %v355_v18, %v293_v6  ;;  %v155_v25 = vmul.f32 %v359_v19, %v293_v6  ;;  %v113_v26 = vpop.f32.mrf.mxu0  ;;  %v129_v27 = vpop.f32.mrf.mxu1 }
  0xd1   :  { %373 = vpow2.f32 %v297_v20  ;;  %v295_v28 = vmul.f32 -1.442695, %v485_v22  ;;  %v299_v29 = vmul.f32 -1.442695, %v487_v23  ;;  %v149_v30 = vmul.f32 %v293_v6, %v113_v26 }
  0xd2   :  { %375 = vpow2.f32 %v301_v21  ;;  %v166_v31 = vadd.f32 %v294_v8, %v151_v24  ;;  %v170_v32 = vadd.f32 %v294_v8, %v155_v25  ;;  %v153_v33 = vmul.f32 %v293_v6, %v129_v27 }
  0xd3   :  { %377 = vpow2.f32 %v295_v28  ;;  %v164_v34 = vadd.f32 %v294_v8, %v149_v30 }
  0xd4   :  { %379 = vpow2.f32 %v299_v29  ;;  %v298_v35 = vmul.f32 -1.442695, %v166_v31  ;;  %v302_v36 = vmul.f32 -1.442695, %v170_v32  ;;  %v168_v37 = vadd.f32 %v294_v8, %v153_v33 }
  0xd5   :  { %v296_v38 = vmul.f32 -1.442695, %v164_v34 }
  0xd6   :  { %381 = vpow2.f32 %v298_v35  ;;  %v300_v39 = vmul.f32 -1.442695, %v168_v37 }
  0xd7   :  { %383 = vpow2.f32 %v302_v36 }
  0xd8   :  { %385 = vpow2.f32 %v296_v38 }
  0xd9   :  { %387 = vpow2.f32 %v300_v39 }
  0xde   :  { %v374_v40 = vpop.eup %373 }
  0xdf   :  { %v376_v41 = vpop.eup %375  ;;  %v197_v42 = vadd.f32 1.0, %v374_v40 }
  0xe0   :  { %v378_v43 = vpop.eup %377  ;;  %v201_v44 = vadd.f32 1.0, %v376_v41 }
  0xe1   :  { %v380_v45 = vpop.eup %379  ;;  %v195_v46 = vadd.f32 1.0, %v378_v43  ;;  %389 = vrcp.f32 %v197_v42 }
  0xe2   :  { %v199_v47 = vadd.f32 1.0, %v380_v45  ;;  %391 = vrcp.f32 %v201_v44 }
  0xe3   :  { %v382_v48 = vpop.eup %381  ;;  %393 = vrcp.f32 %v195_v46 }
  0xe4   :  { %v384_v49 = vpop.eup %383  ;;  %v198_v50 = vadd.f32 1.0, %v382_v48  ;;  %395 = vrcp.f32 %v199_v47 }
  0xe5   :  { %v386_v51 = vpop.eup %385  ;;  %v202_v52 = vadd.f32 1.0, %v384_v49 }
  0xe6   :  { %v388_v53 = vpop.eup %387  ;;  %397 = vrcp.f32 %v198_v50  ;;  %v196_v54 = vadd.f32 1.0, %v386_v51 }
  0xe7   :  { %399 = vrcp.f32 %v202_v52  ;;  %v200_v55 = vadd.f32 1.0, %v388_v53 }
  0xe8   :  { %401 = vrcp.f32 %v196_v54 }
  0xe9   :  { %403 = vrcp.f32 %v200_v55 }
  0xee   :  { %v390_v56 = vpop.eup %389 }
  0xef   :  { %v392_v57 = vpop.eup %391  ;;  %v221_v62 = vmul.f32 %v390_v56, %v479_v14 }
  0xf0   :  { %v394_v58 = vpop.eup %393  ;;  %v225_v1 = vmul.f32 %v392_v57, %v481_v15 }
  0xf1   :  { %v396_v59 = vpop.eup %395  ;;  %v219_v4 = vmul.f32 %v394_v58, %v485_v22 }
  0xf2   :  { %v223_v7 = vmul.f32 %v396_v59, %v487_v23 }
  0xf3   :  { %v398_v60 = vpop.eup %397 }
  0xf4   :  { %v400_v61 = vpop.eup %399  ;;  %v222_v63 = vmul.f32 %v398_v60, %v166_v31 }
  0xf5   :  { %v402_v0 = vpop.eup %401  ;;  %v226_v2 = vmul.f32 %v400_v61, %v170_v32 }
  0xf6   :  { %v404_v3 = vpop.eup %403  ;;  %v327_v5 = vpack.c.bf16 %v222_v63, %v221_v62  ;;  %v220_v6 = vmul.f32 %v402_v0, %v164_v34 }
  0xf7   :  { %v337_v8 = vpack.c.bf16 %v226_v2, %v225_v1  ;;  %v224_v9 = vmul.f32 %v404_v3, %v168_v37 }
  0xf8   :  { %339 = vst [vmem:[#allocation2 + $0x8] sm:$0xff] %v327_v5   ;;  %v322_v10 = vpack.c.bf16 %v220_v6, %v219_v4 }
  0xf9   :  { %341 = vst [vmem:[#allocation2 + $0x18] sm:$0xff] %v337_v8   ;;  %v332_v11 = vpack.c.bf16 %v224_v9, %v223_v7 }
  0xfa   :  { %323 = vst [vmem:[#allocation2] sm:$0xff] %v322_v10  }
  0xfb   :  { %340 = vst [vmem:[#allocation2 + $0x10] sm:$0xff] %v332_v11  }
  0xfc   :  { %416 = shalt.err (!%p413_p4)
}
  0xfd   :  { %s428_s30 = smov 64   ;;  %s429_s5 = smov 4  }
  0xfe   :  { %278 = dma.vmem_to_hbm [thread:$0]  %s273_s2, 512, %s502_s4, [#allocation3], %s428_s30, %s428_s30, %s429_s5  }
  0xff   :  { %425 = dma.done.wait [#allocation3], 512  }
 0x100   :  { %426 = vsyncadd [#allocation3], 4294966784 }
 0x101   :  { %282 = vsyncpa [#allocation3], 1 }

</bundles_post_ra>
